<compile_context>
chip_gen: v5e
topology: v5e:2x2
jax: 0.10.0
libtpu: 0.0.40
codegen_flags: <defaults>
</compile_context>

<pallas_src>
import jax
import jax.numpy as jnp
import numpy as np
from jax.experimental import pallas as pl
from jax.experimental.pallas import tpu as pltpu

EPS = 1e-5  # PyTorch BatchNorm2d default eps


# --------------------------------------------------------------------------- #
# Pass 1: conv (single lane-dense matmul) + BN statistics accumulation
# --------------------------------------------------------------------------- #
def conv_stats_kernel(x_ref, w_ref, y_ref, sum_ref, ssq_ref):
    """x_ref: (TM, W*Cin)   w_ref: (W*Cin, Wout*Cout)
    y_ref: (TM, Wout*Cout)  sum_ref/ssq_ref: (1, Wout*Cout) resident accumulators."""
    @pl.when(pl.program_id(0) == 0)
    def _():
        sum_ref[...] = jnp.zeros_like(sum_ref)
        ssq_ref[...] = jnp.zeros_like(ssq_ref)

    y = jnp.dot(x_ref[...], w_ref[...], preferred_element_type=jnp.float32)
    y_ref[...] = y
    # single-pass stats: per-lane sum and sum of squares (reduced to per-channel
    # quantities in the wrapper with O(Wout*Cout) work).
    sum_ref[...] += jnp.sum(y, axis=0, keepdims=True)
    ssq_ref[...] += jnp.sum(y * y, axis=0, keepdims=True)


# --------------------------------------------------------------------------- #
# Pass 2: normalize + affine + ReLU (lane-dense, fully parallel over row tiles)
# --------------------------------------------------------------------------- #
def bn_relu_kernel(y_ref, scale_ref, shift_ref, o_ref):
    o_ref[...] = jnp.maximum(y_ref[...] * scale_ref[...] + shift_ref[...], 0.0)


def conv_block_forward(x_nchw, w_oihw, bias, gamma, beta, *, row_tile=512):
    """Pallas implementation of ConvBlock.forward for NCHW input."""
    del bias  # conv bias cancels exactly under training-mode BatchNorm (mean-subtracted)
    n, cin, h, w = x_nchw.shape
    cout, cin_w, kh, kw = w_oihw.shape
    assert kh == 1 and cin_w == cin and w >= kw
    wout = w - kw + 1
    m = n * h
    wc_in = w * cin
    wc_out = wout * cout

    # --- layout glue: NCHW -> (N*H, W*Cin) slab ----------------------------
    # TODO(synk): accept/emit NHWC at the module boundary (or fold the layout
    # change into the BlockSpec index_map) to avoid these extra HBM round trips.
    x2d = jnp.transpose(x_nchw, (0, 2, 3, 1)).reshape(m, wc_in).astype(jnp.float32)

    # --- block-Toeplitz weight: (W*Cin, Wout*Cout) -------------------------
    # one matmul covers all Wout output positions with full MXU lane usage.
    w_kc = (jnp.transpose(w_oihw[:, :, 0, :], (2, 1, 0))      # (K, Cin, Cout)
            .reshape(kw * cin, cout).astype(jnp.float32))
    w_toe = jnp.zeros((wc_in, wc_out), jnp.float32)
    for wo in range(wout):
        w_toe = w_toe.at[wo * cin: wo * cin + kw * cin,
                         wo * cout:(wo + 1) * cout].set(w_kc)

    # --- row tiling over M = N*H (pipelined grid axis) ---------------------
    if m >= 8:
        tm = min(row_tile, m)
        tm = max(8, (tm // 8) * 8)          # sublane-aligned tile
    else:
        tm = m                               # tiny case: block == full dims
    m_pad = pl.cdiv(m, tm) * tm
    if m_pad != m:
        # zero rows contribute exactly 0 to sum/sumsq; cnt below uses real M.
        x2d = jnp.pad(x2d, ((0, m_pad - m), (0, 0)))
    n_tiles = m_pad // tm

    # --- pass 1: conv + stats ----------------------------------------------
    cost1 = pl.CostEstimate(
        flops=2 * m_pad * wc_in * wc_out,
        transcendentals=0,
        bytes_accessed=4 * (m_pad * wc_in + wc_in * wc_out
                            + m_pad * wc_out + 2 * wc_out))
    y2d, lane_sum, lane_ssq = pl.pallas_call(
        conv_stats_kernel,
        out_shape=(jax.ShapeDtypeStruct((m_pad, wc_out), jnp.float32),
                   jax.ShapeDtypeStruct((1, wc_out), jnp.float32),
                   jax.ShapeDtypeStruct((1, wc_out), jnp.float32)),
        grid_spec=pltpu.PrefetchScalarGridSpec(
            num_scalar_prefetch=0,
            grid=(n_tiles,),
            in_specs=[pl.BlockSpec((tm, wc_in), lambda i: (i, 0)),
                      pl.BlockSpec((wc_in, wc_out), lambda i: (0, 0))],
            out_specs=(pl.BlockSpec((tm, wc_out), lambda i: (i, 0)),
                       pl.BlockSpec((1, wc_out), lambda i: (0, 0)),
                       pl.BlockSpec((1, wc_out), lambda i: (0, 0)))),
        # stats accumulate sequentially across row tiles.
        # TODO(synk): v7x megacore would want per-core partial sums + a combine.
        compiler_params=pltpu.CompilerParams(
            dimension_semantics=("arbitrary",)),
        cost_estimate=cost1,
    )(x2d, w_toe)

    # --- tiny per-channel finalize (O(Cout) scalar glue) --------------------
    cnt = float(m * wout)                                   # global count N*H*Wout
    s = jnp.sum(lane_sum.reshape(wout, cout), axis=0)
    sq = jnp.sum(lane_ssq.reshape(wout, cout), axis=0)
    mean = s / cnt
    var = jnp.maximum(sq / cnt - mean * mean, 0.0)          # guard cancellation
    inv_std = jax.lax.rsqrt(var + EPS)
    scale_c = gamma.astype(jnp.float32) * inv_std           # (Cout,)
    shift_c = beta.astype(jnp.float32) - mean * scale_c     # (Cout,)
    scale_row = jnp.tile(scale_c, wout).reshape(1, wc_out)  # lane layout wo*Cout+co
    shift_row = jnp.tile(shift_c, wout).reshape(1, wc_out)

    # --- pass 2: normalize + ReLU -------------------------------------------
    cost2 = pl.CostEstimate(
        flops=3 * m_pad * wc_out,
        transcendentals=0,
        bytes_accessed=4 * (2 * m_pad * wc_out + 2 * wc_out))
    out2d = pl.pallas_call(
        bn_relu_kernel,
        out_shape=jax.ShapeDtypeStruct((m_pad, wc_out), jnp.float32),
        grid_spec=pltpu.PrefetchScalarGridSpec(
            num_scalar_prefetch=0,
            grid=(n_tiles,),
            in_specs=[pl.BlockSpec((tm, wc_out), lambda i: (i, 0)),
                      pl.BlockSpec((1, wc_out), lambda i: (0, 0)),
                      pl.BlockSpec((1, wc_out), lambda i: (0, 0))],
            out_specs=pl.BlockSpec((tm, wc_out), lambda i: (i, 0))),
        compiler_params=pltpu.CompilerParams(
            dimension_semantics=("parallel",)),
        cost_estimate=cost2,
    )(y2d, scale_row, shift_row)

    # --- layout glue back to NCHW -------------------------------------------
    out = out2d[:m].reshape(n, h, wout, cout)
    return jnp.transpose(out, (0, 3, 1, 2))                 # (N, Cout, H, Wout)


def reference_forward(x_nchw, w_oihw, bias, gamma, beta):
    """Pure-JAX reference matching PyTorch Conv2d+BatchNorm2d(train)+ReLU."""
    y = jax.lax.conv_general_dilated(
        x_nchw.astype(jnp.float32), w_oihw.astype(jnp.float32),
        window_strides=(1, 1), padding='VALID',
        dimension_numbers=('NCHW', 'OIHW', 'NCHW'))
    y = y + bias.reshape(1, -1, 1, 1)
    mean = jnp.mean(y, axis=(0, 2, 3), keepdims=True)
    var = jnp.mean((y - mean) ** 2, axis=(0, 2, 3), keepdims=True)
    y = (y - mean) * jax.lax.rsqrt(var + EPS)
    y = y * gamma.reshape(1, -1, 1, 1) + beta.reshape(1, -1, 1, 1)
    return jnp.maximum(y, 0.0)


if __name__ == "__main__":
    # Small shapes consistent with the module: kernel (1,17) needs W >= 17.
    # M = N*H = 20 is deliberately not a multiple of the row tile so the
    # padding + multi-tile stats-accumulation paths are exercised.
    N, CIN, COUT, H, W = 2, 4, 8, 10, 32

    key = jax.random.PRNGKey(0)
    kx, kw, kb = jax.random.split(key, 3)
    x = jax.random.normal(kx, (N, CIN, H, W), dtype=jnp.float32)
    conv_w = 0.1 * jax.random.normal(kw, (COUT, CIN, 1, 17), dtype=jnp.float32)
    conv_b = 0.1 * jax.random.normal(kb, (COUT,), dtype=jnp.float32)
    gamma = jnp.ones((COUT,), dtype=jnp.float32)   # BatchNorm2d default init
    beta = jnp.zeros((COUT,), dtype=jnp.float32)
    # TODO(synk): BatchNorm running_mean/running_var updates are a training
    # side effect and are not reproduced; output math is exact.

    out = jax.block_until_ready(
        conv_block_forward(x, conv_w, conv_b, gamma, beta, row_tile=8))
    ref = jax.block_until_ready(
        reference_forward(x, conv_w, conv_b, gamma, beta))

    assert out.shape == (N, COUT, H, W - 17 + 1), out.shape
    np.testing.assert_allclose(np.asarray(out), np.asarray(ref),
                               rtol=1e-4, atol=1e-4)
    print("KERNEL_OK")
</pallas_src>

<mosaic_0001>
module attributes {stable_mosaic.version = 11 : i64} {
  func.func @conv_stats_kernel(%arg0: i32, %arg1: memref<8x128xf32, #tpu.memory_space<vmem>>, %arg2: memref<128x128xf32, #tpu.memory_space<vmem>>, %arg3: memref<8x128xf32, #tpu.memory_space<vmem>>, %arg4: memref<1x128xf32, #tpu.memory_space<vmem>>, %arg5: memref<1x128xf32, #tpu.memory_space<vmem>>) attributes {dimension_semantics = [#tpu.dimension_semantics<arbitrary>], iteration_bounds = array<i64: 3>, scalar_prefetch = 0 : i64, scratch_operands = 0 : i64, tpu.core_type = #tpu.core_type<tc>, window_params = [{transform_indices = @transform_0, window_bounds = array<i64: 8, 128>}, {pipeline_mode = #tpu.pipeline_mode<synchronous>, transform_indices = @transform_1, window_bounds = array<i64: 128, 128>}, {transform_indices = @transform_2, window_bounds = array<i64: 8, 128>}, {pipeline_mode = #tpu.pipeline_mode<synchronous>, transform_indices = @transform_3, window_bounds = array<i64: 1, 128>}, {pipeline_mode = #tpu.pipeline_mode<synchronous>, transform_indices = @transform_4, window_bounds = array<i64: 1, 128>}]} {
    %c0_i32 = arith.constant 0 : i32
    %0 = arith.cmpi eq, %arg0, %c0_i32 : i32
    %1 = arith.extui %0 : i1 to i32
    %c0_i32_0 = arith.constant 0 : i32
    %2 = arith.cmpi ne, %1, %c0_i32_0 : i32
    scf.if %2 {
      %cst_16 = arith.constant 0.000000e+00 : f32
      %18 = vector.broadcast %cst_16 : f32 to vector<1x128xf32>
      %c0_17 = arith.constant 0 : index
      %c0_18 = arith.constant 0 : index
      %19 = vector.load %arg4[%c0_17, %c0_18] : memref<1x128xf32, #tpu.memory_space<vmem>>, vector<1x128xf32>
      tpu.vector_store %arg4[%c0_17, %c0_18], %18 {strides = array<i32>} : memref<1x128xf32, #tpu.memory_space<vmem>>, vector<1x128xf32>,
      %cst_19 = arith.constant 0.000000e+00 : f32
      %20 = vector.broadcast %cst_19 : f32 to vector<1x128xf32>
      %c0_20 = arith.constant 0 : index
      %c0_21 = arith.constant 0 : index
      %21 = vector.load %arg5[%c0_20, %c0_21] : memref<1x128xf32, #tpu.memory_space<vmem>>, vector<1x128xf32>
      tpu.vector_store %arg5[%c0_20, %c0_21], %20 {strides = array<i32>} : memref<1x128xf32, #tpu.memory_space<vmem>>, vector<1x128xf32>,
    } else {
    }
    %c0 = arith.constant 0 : index
    %c0_1 = arith.constant 0 : index
    %3 = vector.load %arg1[%c0, %c0_1] : memref<8x128xf32, #tpu.memory_space<vmem>>, vector<8x128xf32>
    %c0_2 = arith.constant 0 : index
    %c0_3 = arith.constant 0 : index
    %4 = vector.load %arg2[%c0_2, %c0_3] : memref<128x128xf32, #tpu.memory_space<vmem>>, vector<128x128xf32>
    %cst = arith.constant dense<0.000000e+00> : vector<8x128xf32>
    %5 = tpu.matmul %3, %4, %cst {dimension_numbers = #tpu.dot_dimension_numbers<[1], [0], [0], [1], [0, 0, 1, 1], [], []>} : vector<8x128xf32>, vector<128x128xf32>, vector<8x128xf32> -> vector<8x128xf32>
    %c0_4 = arith.constant 0 : index
    %c0_5 = arith.constant 0 : index
    %6 = vector.load %arg3[%c0_4, %c0_5] : memref<8x128xf32, #tpu.memory_space<vmem>>, vector<8x128xf32>
    tpu.vector_store %arg3[%c0_4, %c0_5], %5 {strides = array<i32>} : memref<8x128xf32, #tpu.memory_space<vmem>>, vector<8x128xf32>,
    %c0_6 = arith.constant 0 : index
    %c0_7 = arith.constant 0 : index
    %7 = vector.load %arg4[%c0_6, %c0_7] : memref<1x128xf32, #tpu.memory_space<vmem>>, vector<1x128xf32>
    %cst_8 = arith.constant dense<0.000000e+00> : vector<128xf32>
    %8 = vector.multi_reduction <add>, %5, %cst_8 [0] : vector<8x128xf32> to vector<128xf32>
    %9 = vector.shape_cast %8 : vector<128xf32> to vector<1x128xf32>
    %10 = arith.addf %7, %9 : vector<1x128xf32>
    %c0_9 = arith.constant 0 : index
    %c0_10 = arith.constant 0 : index
    %11 = vector.load %arg4[%c0_9, %c0_10] : memref<1x128xf32, #tpu.memory_space<vmem>>, vector<1x128xf32>
    tpu.vector_store %arg4[%c0_9, %c0_10], %10 {strides = array<i32>} : memref<1x128xf32, #tpu.memory_space<vmem>>, vector<1x128xf32>,
    %c0_11 = arith.constant 0 : index
    %c0_12 = arith.constant 0 : index
    %12 = vector.load %arg5[%c0_11, %c0_12] : memref<1x128xf32, #tpu.memory_space<vmem>>, vector<1x128xf32>
    %13 = arith.mulf %5, %5 : vector<8x128xf32>
    %cst_13 = arith.constant dense<0.000000e+00> : vector<128xf32>
    %14 = vector.multi_reduction <add>, %13, %cst_13 [0] : vector<8x128xf32> to vector<128xf32>
    %15 = vector.shape_cast %14 : vector<128xf32> to vector<1x128xf32>
    %16 = arith.addf %12, %15 : vector<1x128xf32>
    %c0_14 = arith.constant 0 : index
    %c0_15 = arith.constant 0 : index
    %17 = vector.load %arg5[%c0_14, %c0_15] : memref<1x128xf32, #tpu.memory_space<vmem>>, vector<1x128xf32>
    tpu.vector_store %arg5[%c0_14, %c0_15], %16 {strides = array<i32>} : memref<1x128xf32, #tpu.memory_space<vmem>>, vector<1x128xf32>,
    return
  }
  func.func @transform_0(%arg0: i32) -> (i32, i32) {
    %c0_i32 = arith.constant 0 : i32
    %c0_i32_0 = arith.constant 0 : i32
    return %arg0, %c0_i32 : i32, i32
  }
  func.func @transform_1(%arg0: i32) -> (i32, i32) {
    %c0_i32 = arith.constant 0 : i32
    %c0_i32_0 = arith.constant 0 : i32
    %c0_i32_1 = arith.constant 0 : i32
    return %c0_i32, %c0_i32_0 : i32, i32
  }
  func.func @transform_2(%arg0: i32) -> (i32, i32) {
    %c0_i32 = arith.constant 0 : i32
    %c0_i32_0 = arith.constant 0 : i32
    return %arg0, %c0_i32 : i32, i32
  }
  func.func @transform_3(%arg0: i32) -> (i32, i32) {
    %c0_i32 = arith.constant 0 : i32
    %c0_i32_0 = arith.constant 0 : i32
    %c0_i32_1 = arith.constant 0 : i32
    return %c0_i32, %c0_i32_0 : i32, i32
  }
  func.func @transform_4(%arg0: i32) -> (i32, i32) {
    %c0_i32 = arith.constant 0 : i32
    %c0_i32_0 = arith.constant 0 : i32
    %c0_i32_1 = arith.constant 0 : i32
    return %c0_i32, %c0_i32_0 : i32, i32
  }
}

</mosaic_0001>

<bundles_post_ra>
// kernel: tpu_custom_call.1
= control target key start
LH: loop header
LB: loop body
LE: loop exit
PB: predicated region body
PF: predicated region fallthrough
CT: control target
= control target key end

     0   :  { %10 = vsyncpa [#allocation3], 0  ;;  %s910_s0 = inlined_call_operand.hbm [shape: f32[24,128], index: 0, kind: input, shape index: {}]   ;;  %s911_s1 = inlined_call_operand.hbm [shape: f32[128,128], index: 1, kind: input, shape index: {}]   ;;  %s912_s2 = inlined_call_operand.hbm [shape: f32[24,128], index: 2, kind: output, shape index: {0}]   ;;  %s913_s3 = inlined_call_operand.hbm [shape: f32[1,128], index: 3, kind: output, shape index: {1}]   ;;  %s914_s4 = inlined_call_operand.hbm [shape: f32[1,128], index: 4, kind: output, shape index: {2}]  }
   0x1   :  { %12 = vsyncpa [#allocation3 + $0x1], 0 }
   0x2   :  { %13 = vsyncpa [#allocation6], 0 }
   0x3   :  { %14 = vsyncpa [#allocation4], 0 }
   0x4   :  { %16 = vsyncpa [#allocation4 + $0x1], 0 }
   0x5   :  { %17 = vsyncpa [#allocation9], 0  ;;  %s750_s15 = smov 0   ;;  %s752_s16 = smov 0  }
   0x6   :  { %s754_s17 = smov 0   ;;  %s756_s18 = smov 0  }
   0x7 LB: > { %s154_s21 = sshll.u32 %s911_s1, 4  ;;  %s774_s22 = sadd.s32 4294967295, %s717_s18   ;;  %s717_s18 = sphi %s756_s18, %s929_s18   ;;  %s713_s17 = sphi %s754_s17, %s928_s17   ;;  %s709_s16 = sphi %s752_s16, %s927_s16   ;;  %s705_s15 = sphi %s750_s15, %s926_s15   ;;  %s155_s21 = int_to_ptr.hbm [resolvable:$true] %s154_s21 }
   0x8   : > { %p435_p0 = scmp.ge.s32.totalorder %s717_s18, 1  ;;  %p44_p1 = scmp.eq.s32.totalorder %s774_s22, 0 }
   0x9   : > { %p143_p2 = scmp.lt.s32.totalorder %s717_s18, 4  ;;  %s719_s24 = smov [#allocation5]  }
   0xa   : > { %s156_s25 = sshll.u32 %s719_s24, 4  ;;  %s720_s26 = smov 128   ;;  %s157_s25 = int_to_ptr.vmem [resolvable:$true] %s156_s25 }
   0xb   : > { %p780_p4 = pnand %p435_p0, %p143_p2  ;;  %s721_s27 = smov 8  }
   0xc   : > { %s434_s28 = sadd.s32 4294967294, %s717_s18   ;;  %s790_s29 = sadd.s32 1, %s717_s18  }
   0xd   : > { %p469_p5 = pneg %p780_p4  ;;  %s30_s30 = sadd.s32 1, %s713_s17 }
   0xe   : > { %s27_s5 = ssub.s32 %s717_s18, %s790_s29  ;;  %p37_p7 = scmp.ne.s32.totalorder %s713_s17, %s709_s16 }
   0xf   : > { %p470_p6 = pnand %p469_p5, %p44_p1  ;;  %p28_p8 = scmp.eq.s32.totalorder %s27_s5, 0 }
  0x10   : > { %p38_p9 = scmp.eq.s32.totalorder %s717_s18, 0  ;;  %p43_p10 = scmp.ne.s32.totalorder %s709_s16, %s705_s15 }
  0x11   : > { %472 = dma.hbm_to_vmem [thread:$0]  (!%p470_p6), %s155_s21, 2048, %s157_s25, [#allocation6], %s720_s26, %s720_s26, %s721_s27  }
  0x12   : > { %p915_p11 = scmp.eq.s32.totalorder %s774_s22, 2  ;;  %p806_p12 = por %p44_p1, %p43_p10 }
  0x13   : > { %s802_s6 = scalar_select %p28_p8, %s713_s17, %s30_s30  }
  0x14   : > { %p812_p13 = por %p915_p11, %p37_p7  ;;  %p94_p0 = scmp.eq.s32.totalorder %s434_s28, 2 }
  0x15   : > { %p39_p2 = por %p38_p9, %p37_p7  ;;  %s170_s9 = sand.u32 1, %s713_s17  }
  0x16   : > { %p817_p5 = por %p94_p0, %p43_p10  ;;  %p482_p6 = scmp.lt.s32.totalorder %s717_s18, 3 }
  0x17   : > { %s438_s11 = sshll.u32 %s170_s9, 3  ;;  %s439_s12 = sshll.u32 %s717_s18, 3 }
  0x18   : > { %s178_s19 = scalar_lea.hbm %s910_s0, %s439_s12  ;;  %s174_s21 = scalar_lea.vmem [#allocation2], %s438_s11 }
  0x19   : > { %s180_s20 = sshll.u32 %s178_s19, 4  ;;  %s182_s24 = sshll.u32 %s174_s21, 4  ;;  %s181_s20 = int_to_ptr.hbm [resolvable:$true] %s180_s20  ;;  %s183_s24 = int_to_ptr.vmem [resolvable:$true] %s182_s24 }
  0x1a   : > { %p826_p8 = pnand %p482_p6, %p39_p2  ;;  %s171_s26 = scalar_lea.sflag [#allocation3], %s170_s9 }
  0x1b   : > { %s557_s27 = sshra.s32 %s181_s20, 4  ;;  %s564_s11 = scalar_lea.hbm %s910_s0, 24  ;;  %s558_s27 = int_to_ptr.hbm [resolvable:$true] %s557_s27 }
  0x1c   : > { %s559_s28 = scalar_lea.hbm %s558_s27, 8  ;;  %p561_p9 = pneg %p826_p8 }
  0x1d   : > { %p560_p7 = scmp.ne.s32.totalorder %s558_s27, %s559_s28  ;;  %p565_p2 = scmp.lt.s32.totalorder %s558_s27, %s910_s0 }
  0x1e   : > { %p566_p6 = scmp.lt.s32.totalorder %s564_s11, %s559_s28 }
  0x1f   : > { %p562_p10 = pnand %p561_p9, %p560_p7 }
  0x20   : > { %p567_p11 = por %p566_p6, %p565_p2 }
  0x21   : > { %p563_p0 = pneg %p562_p10 }
  0x23   : > { %p568_p3 = pnand %p567_p11, %p563_p0 }
  0x25   : > { %571 = shalt.err (!%p568_p3)
}
  0x26   : > { %476 = dma.hbm_to_vmem [thread:$0]  (!%p826_p8), %s181_s20, 128, %s183_s24, %s171_s26  }
  0x27   : > { %191 = sbr.rel (%p780_p4) target bundleno = 236 (0xec), region = 28  ;;  %s843_s9 = sand.u32 (!%p780_p4), 1, %s709_s16  }
  0x28   : > { %s441_s14 = sshll.u32 (!%p780_p4), %s843_s9, 3  ;;  %s194_s19 = scalar_lea.sflag (!%p780_p4), [#allocation3], %s843_s9 }
  0x29   : > { %s847_s21 = scalar_lea.vmem (!%p780_p4), [#allocation2], %s441_s14 }
  0x2c   : > { %688 = dma.done.wait (%p806_p12), %s194_s19, 128  }
  0x2d   : > { %690 = vsyncadd (%p806_p12), %s194_s19, 4294967168 }
  0x2e   : > { %692 = dma.done.wait (%p44_p1), [#allocation6], 2048  }
  0x2f   : > { %694 = vsyncadd (%p44_p1), [#allocation6], 4294965248  ;;  %s857_s23 = scalar_lea.vmem [#allocation7], %s441_s14  ;;  %p921_p3 = scmp.ne.s32.totalorder %s774_s22, 0 }
  0x31   : > { %231 = sbr.rel (%p921_p3) target bundleno = 57 (0x39), region = 40 }
  0x36   : > { %v722_v0 = vmov 0.0  }
  0x37   : > { %232 = vst [vmem:[#allocation8] sm:$0x1] %v722_v0 }
  0x38   : > { %233 = vst [vmem:[#allocation10] sm:$0x1] %v722_v0 }
  0x39 PF: > { %v250_v1 = vld [vmem:[#allocation5 + $0x78] sm:$0xff]  ;;  %v249_v2 = vld [vmem:[#allocation5 + $0x70] sm:$0xff]  ;;  %v248_v3 = vld [vmem:[#allocation5 + $0x68] sm:$0xff]  ;;  %s446_s7 = sshll.u32 %s774_s22, 3  ;;  %s304_s26 = sshll.u32 %s857_s23, 4  ;;  %s305_s26 = int_to_ptr.vmem [resolvable:$true] %s304_s26 }
  0x3a   : > { %251 = vmatpush.msra.mxu0 %v250_v1  ;;  %v247_v4 = vld [vmem:[#allocation5 + $0x60] sm:$0xff]  ;;  %v246_v5 = vld [vmem:[#allocation5 + $0x58] sm:$0xff]  ;;  %v245_v6 = vld [vmem:[#allocation5 + $0x50] sm:$0xff]  ;;  %s302_s25 = scalar_lea.hbm %s912_s2, %s446_s7  ;;  %s292_s28 = scalar_lea.sflag [#allocation4], %s843_s9 }
  0x3b   : > { %v244_v7 = vld [vmem:[#allocation5 + $0x48] sm:$0xff]  ;;  %v243_v8 = vld [vmem:[#allocation5 + $0x40] sm:$0xff]  ;;  %v242_v9 = vld [vmem:[#allocation5 + $0x38] sm:$0xff]  ;;  %s306_s27 = sshll.u32 %s302_s25, 4  ;;  %s607_s13 = scalar_lea.hbm %s912_s2, 24  ;;  %s307_s27 = int_to_ptr.hbm [resolvable:$true] %s306_s27 }
  0x3c   : > { %252 = vmatpush.msra.mxu0 %v249_v2  ;;  %v241_v10 = vld [vmem:[#allocation5 + $0x30] sm:$0xff]  ;;  %v240_v11 = vld [vmem:[#allocation5 + $0x28] sm:$0xff]  ;;  %v239_v12 = vld [vmem:[#allocation5 + $0x20] sm:$0xff]  ;;  %s601_s30 = sshra.s32 %s307_s27, 4  ;;  %s602_s30 = int_to_ptr.hbm [resolvable:$true] %s601_s30 }
  0x3d   : > { %v238_v13 = vld [vmem:[#allocation5 + $0x18] sm:$0xff]  ;;  %v237_v14 = vld [vmem:[#allocation5 + $0x10] sm:$0xff]  ;;  %v236_v15 = vld [vmem:[#allocation5 + $0x8] sm:$0xff]  ;;  %s603_s5 = scalar_lea.hbm %s602_s30, 8  ;;  %p608_p12 = scmp.lt.s32.totalorder %s602_s30, %s912_s2 }
  0x3e   : > { %253 = vmatpush.msra.mxu0 %v248_v3  ;;  %v235_v16 = vld [vmem:[#allocation5] sm:$0xff]  ;;  %v234_v17 = vld [vmem:[%s847_s21] sm:$0xff]  ;;  %p604_p1 = scmp.ne.s32.totalorder %s602_s30, %s603_s5  ;;  %p609_p8 = scmp.lt.s32.totalorder %s607_s13, %s603_s5 }
  0x40   : > { %254 = vmatpush.msra.mxu0 %v247_v4  ;;  %p605_p4 = pnand %p604_p1, %p812_p13  ;;  %p610_p7 = por %p609_p8, %p608_p12 }
  0x42   : > { %255 = vmatpush.msra.mxu0 %v246_v5  ;;  %p606_p11 = pneg %p605_p4 }
  0x44   : > { %256 = vmatpush.msra.mxu0 %v245_v6  ;;  %p611_p9 = pnand %p610_p7, %p606_p11 }
  0x46   : > { %257 = vmatpush.msra.mxu0 %v244_v7 }
  0x48   : > { %258 = vmatpush.msra.mxu0 %v243_v8 }
  0x4a   : > { %259 = vmatpush.msra.mxu0 %v242_v9 }
  0x4c   : > { %260 = vmatpush.msra.mxu0 %v241_v10 }
  0x4e   : > { %261 = vmatpush.msra.mxu0 %v240_v11 }
  0x50   : > { %262 = vmatpush.msra.mxu0 %v239_v12 }
  0x52   : > { %263 = vmatpush.msra.mxu0 %v238_v13 }
  0x54   : > { %264 = vmatpush.msra.mxu0 %v237_v14 }
  0x56   : > { %265 = vmatpush.msra.mxu0 %v236_v15 }
  0x58   : > { %266 = vmatpush.msra.mxu0 %v235_v16 }
  0x59   : > { %267 = vmatmul.f32.vlgmr.msra.gmra.mxu0 %v234_v17 }
  0xd6   : > { %v268_v18 = vpop.f32.mrf.mxu0 }
  0xd7   : > { %v273_v19 = vrot.slane %v268_v18, 4  ;;  %v282_v20 = vmul.f32 %v268_v18, %v268_v18  ;;  %271 = vst [vmem:[%s857_s23] sm:$0xff] %v268_v18 }
  0xd8   : > { %614 = shalt.err (!%p611_p9)
}
  0xd9   : > { %459 = dma.vmem_to_hbm [thread:$0]  (%p812_p13), %s305_s26, 128, %s307_s27, %s292_s28   ;;  %v274_v21 = vadd.f32 %v273_v19, %v268_v18  ;;  %v283_v22 = vrot.slane %v282_v20, 4  ;;  %v272_v29 = vld [vmem:[#allocation8] sm:$0x1]  ;;  %v281_v32 = vld [vmem:[#allocation10] sm:$0x1] }
  0xda   : > { %s723_s9 = smov [#allocation8]   ;;  %s318_s20 = sshll.u32 %s913_s3, 4  ;;  %s319_s20 = int_to_ptr.hbm [resolvable:$true] %s318_s20 }
  0xdb   : > { %v275_v23 = vrot.slane %v274_v21, 2  ;;  %v284_v24 = vadd.f32 %v283_v22, %v282_v20  ;;  %s316_s21 = sshll.u32 %s723_s9, 4  ;;  %s724_s8 = smov [#allocation10]   ;;  %s317_s21 = int_to_ptr.vmem [resolvable:$true] %s316_s21 }
  0xdc   : > { %s328_s24 = sshll.u32 %s724_s8, 4  ;;  %s330_s27 = sshll.u32 %s914_s4, 4  ;;  %s329_s24 = int_to_ptr.vmem [resolvable:$true] %s328_s24  ;;  %s331_s27 = int_to_ptr.hbm [resolvable:$true] %s330_s27 }
  0xdd   : > { %v276_v25 = vadd.f32 %v275_v23, %v274_v21  ;;  %v285_v26 = vrot.slane %v284_v24, 2  ;;  %p922_p13 = scmp.eq.s32.totalorder %s774_s22, 2 }
  0xdf   : > { %v277_v27 = vrot.slane %v276_v25, 1  ;;  %v286_v28 = vadd.f32 %v285_v26, %v284_v24  ;;  %p923_p10 = pmov %p922_p13 }
  0xe1   : > { %v278_v30 = vadd.f32 %v277_v27, %v276_v25  ;;  %v287_v31 = vrot.slane %v286_v28, 1  ;;  %p924_p0 = pmov %p923_p10 }
  0xe3   : > { %v279_v33 = vadd.f32 %v278_v30, %v272_v29  ;;  %v288_v34 = vadd.f32 %v287_v31, %v286_v28 }
  0xe5   : > { %280 = vst [vmem:[#allocation8] sm:$0x1] %v279_v33  ;;  %v289_v35 = vadd.f32 %v288_v34, %v281_v32 }
  0xe6   : > { %461 = dma.vmem_to_hbm [thread:$0]  (%p922_p13), %s317_s21, 16, %s319_s20, [#allocation9]  }
  0xe7   : > { %290 = vst [vmem:[#allocation10] sm:$0x1] %v289_v35 }
  0xe8   : > { %463 = dma.vmem_to_hbm [thread:$0]  (%p923_p10), %s329_s24, 16, %s331_s27, [#allocation9]  }
  0xe9   : > { %696 = dma.done.wait (%p924_p0), [#allocation9], 32   ;;  %p925_p2 = pmov %p924_p0 }
  0xeb   : > { %698 = vsyncadd (%p925_p2), [#allocation9], 4294967264 }
  0xec PF: > { %p488_p6 = scmp.ge.s32.totalorder %s717_s18, 2  ;;  %s352_s28 = sand.u32 1, %s705_s15  }
  0xed   : > { %s353_s30 = scalar_lea.sflag [#allocation4], %s352_s28 }
  0xee   : > { %p478_p3 = pnand %p488_p6, %p817_p5 }
  0xf0   : > { %p479_p1 = pneg %p478_p3 }
  0xf2   : > { %700 = dma.done.wait (%p479_p1), %s353_s30, 128  }
  0xf3   : > { %702 = vsyncadd (%p479_p1), %s353_s30, 4294967168  ;;  %p20_p4 = scmp.ge.s32.totalorder %s790_s29, 5   ;;  %s926_s15 = smov %s709_s16 }
  0xf4   : > { %s927_s16 = smov %s713_s17  ;;  %s928_s17 = smov %s802_s6 }
  0xf5   : > { %s929_s18 = smov %s790_s29  ;;  %22 = sbr.rel (!%p20_p4) target bundleno = 7 (0x7), region = 97 }
  0xfa   :  { %359 = vsyncpa [#allocation3], 1 }
  0xfb   :  { %361 = vsyncpa [#allocation3 + $0x1], 1 }
  0xfc   :  { %362 = vsyncpa [#allocation6], 1 }
  0xfd   :  { %363 = vsyncpa [#allocation4], 1 }
  0xfe   :  { %365 = vsyncpa [#allocation4 + $0x1], 1 }
  0xff   :  { %366 = vsyncpa [#allocation9], 1 }

</bundles_post_ra>
